<compile_context>
chip_gen: v7x
topology: tpu7x:2x2x1
jax: 0.10.0
libtpu: 0.0.40
codegen_flags: <defaults>
</compile_context>

<pallas_src>
import jax
import jax.numpy as jnp
from jax import lax
from jax.experimental import pallas as pl
from jax.experimental.pallas import tpu as pltpu

INPUT_SIZE = 32
LIQUID_STATE_SIZE = 64
LEAK_RATE = 0.1


def _cdiv(a: int, b: int) -> int:
    return -(-a // b)


def _round_up(n: int, m: int) -> int:
    return ((n + m - 1) // m) * m


def _liquid_neuron_kernel(x_ref, h_ref, w_in_ref, w_liq_ref, b_cat_ref,
                          w_out_ref, b_out_ref, out_ref, new_h_ref):
    # Loads; compute in f32 regardless of the HBM-boundary dtype.
    x = x_ref[...].astype(jnp.float32)
    h = h_ref[...].astype(jnp.float32)

    # input_projection(x) + liquid_state(hidden); biases pre-folded (b_in+b_liq)
    z = (jnp.dot(x, w_in_ref[...], preferred_element_type=jnp.float32)
         + jnp.dot(h, w_liq_ref[...], preferred_element_type=jnp.float32)
         + b_cat_ref[...])

    # liquid_tanh_activation:
    #   tanh(z) + 0.1*sin(0.5 z)*cos(0.3 z) == tanh(z) + 0.05*(sin(0.8 z)+sin(0.2 z))
    activated = jnp.tanh(z) + 0.05 * (jnp.sin(0.8 * z) + jnp.sin(0.2 * z))

    # leaky hidden-state integration (returned as second output)
    new_h_ref[...] = ((1.0 - LEAK_RATE) * h
                      + LEAK_RATE * activated).astype(new_h_ref.dtype)

    # output_projection(activated): produce a lane-dense (1, TB) row directly
    # via a trans-B matmul (same dimension_numbers as flash-attention q.k^T),
    # instead of a (TB, 1) column that would force a 128x-padded VMEM block
    # and masked partial stores.
    out_row = lax.dot_general(
        w_out_ref[...], activated,                      # (1, H) x (TB, H)^T
        dimension_numbers=(((1,), (1,)), ((), ())),
        preferred_element_type=jnp.float32)             # -> (1, TB)
    out_ref[...] = (out_row + b_out_ref[0, 0])[None].astype(out_ref.dtype)


def liquid_neuron_forward(x, hidden, params, *, block_batch=4096):
    """x: [B, input_size]; hidden: [B, liquid_state_size] (f32 or bf16).
    Returns (output [B, 1] f32, new_hidden [B, liquid_state_size] = hidden.dtype)."""
    B, F_in = x.shape
    H = hidden.shape[1]
    w_in, b_in, w_liq, b_liq, w_out, b_out = params

    w_in = w_in.astype(jnp.float32)
    w_liq = w_liq.astype(jnp.float32)
    b_cat = (b_in + b_liq).reshape(1, H).astype(jnp.float32)   # fused bias row
    w_out_row = w_out.reshape(1, H).astype(jnp.float32)        # (1, H) row for trans-B dot
    b_out_s = b_out.reshape(1, 1).astype(jnp.float32)          # SMEM scalar

    # --- balanced batch tiling ---------------------------------------------
    num_tiles = max(1, _cdiv(B, block_batch))
    if num_tiles == 1 and B > 8:
        num_tiles = 2        # >=2 grid steps -> v7x megacore can shard; harmless on 1-TC chips
    TB = _round_up(_cdiv(B, num_tiles), 8)   # balanced tiles, <8 pad rows each
    Bp = num_tiles * TB
    if Bp != B:
        pad = Bp - B
        x = jnp.pad(x, ((0, pad), (0, 0)))
        hidden = jnp.pad(hidden, ((0, pad), (0, 0)))

    x_b = x.dtype.itemsize
    h_b = hidden.dtype.itemsize

    # VMEM: x/h/new_h blocks are lane-padded to 128 in VMEM, out row block is
    # sublane-padded to 8; double-buffered, plus weights/margin.
    per_row_vmem = 128 * x_b + 2 * (128 * h_b) + 8 * 4
    vmem_limit = int(min(64 << 20, max(24 << 20, 2 * TB * per_row_vmem + (4 << 20))))

    cost = pl.CostEstimate(
        flops=2 * Bp * H * (F_in + H + 1) + 8 * Bp * H,
        transcendentals=3 * Bp * H,
        bytes_accessed=Bp * (F_in * x_b + 2 * H * h_b + 4)
                       + (F_in * H + H * H + 2 * H + 1) * 4,
    )

    out3, new_h = pl.pallas_call(
        _liquid_neuron_kernel,
        out_shape=(
            jax.ShapeDtypeStruct((num_tiles, 1, TB), jnp.float32),
            jax.ShapeDtypeStruct((Bp, H), hidden.dtype),
        ),
        grid=(num_tiles,),
        in_specs=[
            # per-batch-tile activations
            pl.BlockSpec((TB, F_in), lambda i: (i, 0)),
            pl.BlockSpec((TB, H), lambda i: (i, 0)),
            # weights / fused bias: full blocks, constant index_map -> VMEM resident
            pl.BlockSpec((F_in, H), lambda i: (0, 0)),
            pl.BlockSpec((H, H), lambda i: (0, 0)),
            pl.BlockSpec((1, H), lambda i: (0, 0)),
            pl.BlockSpec((1, H), lambda i: (0, 0)),
            # output bias as an SMEM scalar
            pl.BlockSpec(memory_space=pltpu.MemorySpace.SMEM),
        ],
        out_specs=(
            # lane-dense scalar output: one (1, TB) row per grid step
            pl.BlockSpec((1, 1, TB), lambda i: (i, 0, 0)),
            pl.BlockSpec((TB, H), lambda i: (i, 0)),
        ),
        compiler_params=pltpu.CompilerParams(
            dimension_semantics=("parallel",),
            vmem_limit_bytes=vmem_limit,
        ),
        cost_estimate=cost,
    )(x, hidden, w_in, w_liq, b_cat, w_out_row, b_out_s)

    out = out3.reshape(Bp)[:B].reshape(B, 1)
    new_h = new_h[:B]
    return out, new_h


def _init_linear(key, fan_in, fan_out):
    # Matches torch nn.Linear default init: U(-1/sqrt(fan_in), 1/sqrt(fan_in)).
    kw, kb = jax.random.split(key)
    bound = 1.0 / jnp.sqrt(fan_in)
    # stored pre-transposed: [in, out]
    w = jax.random.uniform(kw, (fan_in, fan_out), jnp.float32, -bound, bound)
    b = jax.random.uniform(kb, (1, fan_out), jnp.float32, -bound, bound)
    return w, b


def init_params(key):
    k1, k2, k3 = jax.random.split(key, 3)
    w_in, b_in = _init_linear(k1, INPUT_SIZE, LIQUID_STATE_SIZE)
    w_liq, b_liq = _init_linear(k2, LIQUID_STATE_SIZE, LIQUID_STATE_SIZE)
    w_out, b_out = _init_linear(k3, LIQUID_STATE_SIZE, 1)
    return (w_in, b_in, w_liq, b_liq, w_out, b_out)


def reference_forward(x, hidden, params):
    w_in, b_in, w_liq, b_liq, w_out, b_out = params
    hp = lax.Precision.HIGHEST
    z = (jnp.dot(x, w_in, precision=hp) + b_in
         + jnp.dot(hidden, w_liq, precision=hp) + b_liq)
    act = jnp.tanh(z) + 0.1 * jnp.sin(z * 0.5) * jnp.cos(z * 0.3)
    new_h = (1.0 - LEAK_RATE) * hidden + LEAK_RATE * act
    out = jnp.dot(act, w_out, precision=hp) + b_out
    return out, new_h


if __name__ == "__main__":
    key = jax.random.PRNGKey(0)
    kp, kx, kh = jax.random.split(key, 3)

    params = init_params(kp)

    # --- small batch (single padded 8-row tile) ---
    B = 2
    x = jax.random.normal(kx, (B, INPUT_SIZE), jnp.float32)
    hidden = jnp.zeros((B, LIQUID_STATE_SIZE), jnp.float32)  # reset_state()

    out, new_h = jax.block_until_ready(liquid_neuron_forward(x, hidden, params))
    ref_out, ref_h = reference_forward(x, hidden, params)
    assert out.shape == (B, 1)
    assert new_h.shape == (B, LIQUID_STATE_SIZE)
    assert jnp.allclose(out, ref_out, atol=5e-4, rtol=5e-4)
    assert jnp.allclose(new_h, ref_h, atol=5e-4, rtol=5e-4)

    # --- ragged batch over a multi-step grid (B % TB != 0, balanced tiles) ---
    B2 = 130
    x2 = jax.random.normal(kx, (B2, INPUT_SIZE), jnp.float32)
    h2 = 0.1 * jax.random.normal(kh, (B2, LIQUID_STATE_SIZE), jnp.float32)
    out2, new_h2 = jax.block_until_ready(
        liquid_neuron_forward(x2, h2, params, block_batch=64))
    ref_out2, ref_h2 = reference_forward(x2, h2, params)
    assert out2.shape == (B2, 1)
    assert new_h2.shape == (B2, LIQUID_STATE_SIZE)
    assert jnp.allclose(out2, ref_out2, atol=5e-4, rtol=5e-4)
    assert jnp.allclose(new_h2, ref_h2, atol=5e-4, rtol=5e-4)

    # --- bf16 hidden state at the HBM boundary (recurrent-use option) ---
    h3 = h2.astype(jnp.bfloat16)
    out3, new_h3 = jax.block_until_ready(liquid_neuron_forward(x2, h3, params))
    assert new_h3.dtype == jnp.bfloat16
    assert jnp.allclose(out3, ref_out2, atol=3e-2, rtol=3e-2)
    assert jnp.allclose(new_h3.astype(jnp.float32), ref_h2, atol=3e-2, rtol=3e-2)

    print("KERNEL_OK")
</pallas_src>

<mosaic_0001>
module attributes {stable_mosaic.version = 11 : i64} {
  func.func @_liquid_neuron_kernel(%arg0: i32, %arg1: memref<8x32xf32, #tpu.memory_space<vmem>>, %arg2: memref<8x64xf32, #tpu.memory_space<vmem>>, %arg3: memref<32x64xf32, #tpu.memory_space<vmem>>, %arg4: memref<64x64xf32, #tpu.memory_space<vmem>>, %arg5: memref<1x64xf32, #tpu.memory_space<vmem>>, %arg6: memref<1x64xf32, #tpu.memory_space<vmem>>, %arg7: memref<1x1xf32, #tpu.memory_space<smem>>, %arg8: memref<1x1x8xf32, #tpu.memory_space<vmem>>, %arg9: memref<8x64xf32, #tpu.memory_space<vmem>>) attributes {dimension_semantics = [#tpu.dimension_semantics<parallel>], iteration_bounds = array<i64: 1>, scalar_prefetch = 0 : i64, scratch_operands = 0 : i64, tpu.core_type = #tpu.core_type<tc>, window_params = [{transform_indices = @transform_0, window_bounds = array<i64: 8, 32>}, {transform_indices = @transform_1, window_bounds = array<i64: 8, 64>}, {pipeline_mode = #tpu.pipeline_mode<synchronous>, transform_indices = @transform_2, window_bounds = array<i64: 32, 64>}, {pipeline_mode = #tpu.pipeline_mode<synchronous>, transform_indices = @transform_3, window_bounds = array<i64: 64, 64>}, {pipeline_mode = #tpu.pipeline_mode<synchronous>, transform_indices = @transform_4, window_bounds = array<i64: 1, 64>}, {pipeline_mode = #tpu.pipeline_mode<synchronous>, transform_indices = @transform_5, window_bounds = array<i64: 1, 64>}, {transform_indices = @transform_6, window_bounds = array<i64: 1, 1>}, {transform_indices = @transform_7, window_bounds = array<i64: 1, 1, 8>}, {transform_indices = @transform_8, window_bounds = array<i64: 8, 64>}]} {
    %c0 = arith.constant 0 : index
    %c0_0 = arith.constant 0 : index
    %0 = vector.load %arg1[%c0, %c0_0] : memref<8x32xf32, #tpu.memory_space<vmem>>, vector<8x32xf32>
    %c0_1 = arith.constant 0 : index
    %c0_2 = arith.constant 0 : index
    %1 = vector.load %arg2[%c0_1, %c0_2] : memref<8x64xf32, #tpu.memory_space<vmem>>, vector<8x64xf32>
    %c0_3 = arith.constant 0 : index
    %c0_4 = arith.constant 0 : index
    %2 = vector.load %arg3[%c0_3, %c0_4] : memref<32x64xf32, #tpu.memory_space<vmem>>, vector<32x64xf32>
    %cst = arith.constant dense<0.000000e+00> : vector<8x64xf32>
    %3 = tpu.matmul %0, %2, %cst {dimension_numbers = #tpu.dot_dimension_numbers<[1], [0], [0], [1], [0, 0, 1, 1], [], []>} : vector<8x32xf32>, vector<32x64xf32>, vector<8x64xf32> -> vector<8x64xf32>
    %c0_5 = arith.constant 0 : index
    %c0_6 = arith.constant 0 : index
    %4 = vector.load %arg4[%c0_5, %c0_6] : memref<64x64xf32, #tpu.memory_space<vmem>>, vector<64x64xf32>
    %cst_7 = arith.constant dense<0.000000e+00> : vector<8x64xf32>
    %5 = tpu.matmul %1, %4, %cst_7 {dimension_numbers = #tpu.dot_dimension_numbers<[1], [0], [0], [1], [0, 0, 1, 1], [], []>} : vector<8x64xf32>, vector<64x64xf32>, vector<8x64xf32> -> vector<8x64xf32>
    %6 = arith.addf %3, %5 : vector<8x64xf32>
    %c0_8 = arith.constant 0 : index
    %c0_9 = arith.constant 0 : index
    %7 = vector.load %arg5[%c0_8, %c0_9] : memref<1x64xf32, #tpu.memory_space<vmem>>, vector<1x64xf32>
    %8 = vector.broadcast %7 : vector<1x64xf32> to vector<8x64xf32>
    %9 = arith.addf %6, %8 : vector<8x64xf32>
    %10 = math.tanh %9 : vector<8x64xf32>
    %cst_10 = arith.constant 8.000000e-01 : f32
    %11 = vector.broadcast %cst_10 : f32 to vector<8x64xf32>
    %12 = arith.mulf %11, %9 : vector<8x64xf32>
    %13 = math.sin %12 : vector<8x64xf32>
    %cst_11 = arith.constant 2.000000e-01 : f32
    %14 = vector.broadcast %cst_11 : f32 to vector<8x64xf32>
    %15 = arith.mulf %14, %9 : vector<8x64xf32>
    %16 = math.sin %15 : vector<8x64xf32>
    %17 = arith.addf %13, %16 : vector<8x64xf32>
    %cst_12 = arith.constant 5.000000e-02 : f32
    %18 = vector.broadcast %cst_12 : f32 to vector<8x64xf32>
    %19 = arith.mulf %18, %17 : vector<8x64xf32>
    %20 = arith.addf %10, %19 : vector<8x64xf32>
    %cst_13 = arith.constant 0.899999976 : f32
    %21 = vector.broadcast %cst_13 : f32 to vector<8x64xf32>
    %22 = arith.mulf %21, %1 : vector<8x64xf32>
    %cst_14 = arith.constant 1.000000e-01 : f32
    %23 = vector.broadcast %cst_14 : f32 to vector<8x64xf32>
    %24 = arith.mulf %23, %20 : vector<8x64xf32>
    %25 = arith.addf %22, %24 : vector<8x64xf32>
    %c0_15 = arith.constant 0 : index
    %c0_16 = arith.constant 0 : index
    %26 = vector.load %arg9[%c0_15, %c0_16] : memref<8x64xf32, #tpu.memory_space<vmem>>, vector<8x64xf32>
    tpu.vector_store %arg9[%c0_15, %c0_16], %25 {strides = array<i32>} : memref<8x64xf32, #tpu.memory_space<vmem>>, vector<8x64xf32>,
    %c0_17 = arith.constant 0 : index
    %c0_18 = arith.constant 0 : index
    %27 = vector.load %arg6[%c0_17, %c0_18] : memref<1x64xf32, #tpu.memory_space<vmem>>, vector<1x64xf32>
    %cst_19 = arith.constant dense<0.000000e+00> : vector<1x8xf32>
    %28 = tpu.matmul %27, %20, %cst_19 {dimension_numbers = #tpu.dot_dimension_numbers<[1], [1], [0], [0], [0, 0, 1, 0], [], []>} : vector<1x64xf32>, vector<8x64xf32>, vector<1x8xf32> -> vector<1x8xf32>
    %c0_20 = arith.constant 0 : index
    %c0_21 = arith.constant 0 : index
    %29 = memref.load %arg7[%c0_20, %c0_21] : memref<1x1xf32, #tpu.memory_space<smem>>
    %30 = vector.broadcast %29 : f32 to vector<1x8xf32>
    %31 = arith.addf %28, %30 : vector<1x8xf32>
    %32 = vector.shape_cast %31 : vector<1x8xf32> to vector<1x1x8xf32>
    %c0_22 = arith.constant 0 : index
    %c0_23 = arith.constant 0 : index
    %c0_24 = arith.constant 0 : index
    %33 = vector.load %arg8[%c0_22, %c0_23, %c0_24] : memref<1x1x8xf32, #tpu.memory_space<vmem>>, vector<1x1x8xf32>
    tpu.vector_store %arg8[%c0_22, %c0_23, %c0_24], %32 {strides = array<i32>} : memref<1x1x8xf32, #tpu.memory_space<vmem>>, vector<1x1x8xf32>,
    return
  }
  func.func @transform_0(%arg0: i32) -> (i32, i32) {
    %c0_i32 = arith.constant 0 : i32
    %c0_i32_0 = arith.constant 0 : i32
    return %arg0, %c0_i32 : i32, i32
  }
  func.func @transform_1(%arg0: i32) -> (i32, i32) {
    %c0_i32 = arith.constant 0 : i32
    %c0_i32_0 = arith.constant 0 : i32
    return %arg0, %c0_i32 : i32, i32
  }
  func.func @transform_2(%arg0: i32) -> (i32, i32) {
    %c0_i32 = arith.constant 0 : i32
    %c0_i32_0 = arith.constant 0 : i32
    %c0_i32_1 = arith.constant 0 : i32
    return %c0_i32, %c0_i32_0 : i32, i32
  }
  func.func @transform_3(%arg0: i32) -> (i32, i32) {
    %c0_i32 = arith.constant 0 : i32
    %c0_i32_0 = arith.constant 0 : i32
    %c0_i32_1 = arith.constant 0 : i32
    return %c0_i32, %c0_i32_0 : i32, i32
  }
  func.func @transform_4(%arg0: i32) -> (i32, i32) {
    %c0_i32 = arith.constant 0 : i32
    %c0_i32_0 = arith.constant 0 : i32
    %c0_i32_1 = arith.constant 0 : i32
    return %c0_i32, %c0_i32_0 : i32, i32
  }
  func.func @transform_5(%arg0: i32) -> (i32, i32) {
    %c0_i32 = arith.constant 0 : i32
    %c0_i32_0 = arith.constant 0 : i32
    %c0_i32_1 = arith.constant 0 : i32
    return %c0_i32, %c0_i32_0 : i32, i32
  }
  func.func @transform_6(%arg0: i32) -> (i32, i32) {
    %c0_i32 = arith.constant 0 : i32
    %c0_i32_0 = arith.constant 0 : i32
    %c0_i32_1 = arith.constant 0 : i32
    return %c0_i32, %c0_i32_0 : i32, i32
  }
  func.func @transform_7(%arg0: i32) -> (i32, i32, i32) {
    %c0_i32 = arith.constant 0 : i32
    %c0_i32_0 = arith.constant 0 : i32
    %c0_i32_1 = arith.constant 0 : i32
    return %arg0, %c0_i32, %c0_i32_0 : i32, i32, i32
  }
  func.func @transform_8(%arg0: i32) -> (i32, i32) {
    %c0_i32 = arith.constant 0 : i32
    %c0_i32_0 = arith.constant 0 : i32
    return %arg0, %c0_i32 : i32, i32
  }
}

</mosaic_0001>

<bundles_post_ra>
// kernel: tpu_custom_call.1
= control target key start
LH: loop header
LB: loop body
LE: loop exit
PB: predicated region body
PF: predicated region fallthrough
CT: control target
= control target key end

     0   :  { %15 = vsyncpa [#allocation4], 0  ;;  %s1062_s0 = inlined_call_operand.hbm [shape: f32[8,32], index: 0, kind: input, shape index: {}]   ;;  %s1063_s1 = inlined_call_operand.hbm [shape: f32[8,64], index: 1, kind: input, shape index: {}]   ;;  %s1064_s2 = inlined_call_operand.hbm [shape: f32[32,64], index: 2, kind: input, shape index: {}]   ;;  %s1065_s3 = inlined_call_operand.hbm [shape: f32[64,64], index: 3, kind: input, shape index: {}]   ;;  %s1066_s4 = inlined_call_operand.vmem [shape: f32[1,64], index: 4, kind: input, shape index: {}]   ;;  %s1067_s5 = inlined_call_operand.vmem [shape: f32[1,64], index: 5, kind: input, shape index: {}]   ;;  %s1068_s6 = inlined_call_operand.<no memory space> [shape: f32[1,1], index: 6, kind: input, shape index: {}]   ;;  %s1069_s7 = inlined_call_operand.hbm [shape: f32[1,1,8], index: 7, kind: output, shape index: {0}]   ;;  %s1070_s8 = inlined_call_operand.hbm [shape: f32[8,64], index: 8, kind: output, shape index: {1}]  }
   0x1   :  { %16 = vsyncpa [#allocation7], 0 }
   0x2   :  { %17 = vsyncpa [#allocation10], 0 }
   0x3   :  { %18 = vsyncpa [#allocation5], 0 }
   0x4   :  { %19 = vsyncpa [#allocation13], 0  ;;  %s841_s27 = smov [#allocation6]   ;;  %s842_s29 = smov [#allocation3]  }
   0x5   :  { %s36_s28 = sshll.u32 %s841_s27, 4  ;;  %s26_s30 = sshll.u32 %s842_s29, 4  ;;  %s37_s28 = int_to_ptr.vmem [resolvable:$true] %s36_s28  ;;  %s27_s30 = int_to_ptr.vmem [resolvable:$true] %s26_s30 }
   0x6   :  { %s699_s11 = scalar_lea.hbm %s1063_s1, 128 }
   0x7   :  { %p700_p0 = scmp.ne.s32.totalorder %s1063_s1, %s699_s11  ;;  %p703_p1 = scmp.lt.u32.totalorder %s699_s11, %s1063_s1 }
   0x9   :  { %p705_p2 = pnand %p703_p1, %p700_p0 }
   0xb   :  { %708 = shalt.err (!%p705_p2)
}
   0xc   :  { %s709_s16 = scalar_lea.vmem %s37_s28, 128  ;;  %p714_p4 = scmp.lt.s32.totalorder %s37_s28, %s37_s28 }
   0xd   :  { %p710_p3 = scmp.ne.s32.totalorder %s37_s28, %s709_s16  ;;  %p715_p5 = scmp.lt.s32.totalorder %s709_s16, %s709_s16 }
   0xf   :  { %p716_p6 = por %p715_p5, %p714_p4 }
  0x11   :  { %p717_p7 = pnand %p716_p6, %p710_p3 }
  0x13   :  { %720 = shalt.err (!%p717_p7)
}
  0x14   :  { %39 = dma.hbm_to_vmem [thread:$0]  %s1063_s1, 128, %s37_s28, [#allocation7]  }
  0x15   :  { %s721_s21 = scalar_lea.hbm %s1062_s0, 128 }
  0x16   :  { %p722_p8 = scmp.ne.s32.totalorder %s1062_s0, %s721_s21  ;;  %p725_p9 = scmp.lt.u32.totalorder %s721_s21, %s1062_s0 }
  0x18   :  { %p727_p10 = pnand %p725_p9, %p722_p8 }
  0x1a   :  { %730 = shalt.err (!%p727_p10)
}
  0x1b   :  { %s731_s26 = scalar_lea.vmem %s27_s30, 128  ;;  %p736_p12 = scmp.lt.s32.totalorder %s27_s30, %s27_s30 }
  0x1c   :  { %p732_p11 = scmp.ne.s32.totalorder %s27_s30, %s731_s26  ;;  %p737_p13 = scmp.lt.s32.totalorder %s731_s26, %s731_s26 }
  0x1e   :  { %p738_p0 = por %p737_p13, %p736_p12 }
  0x20   :  { %p739_p1 = pnand %p738_p0, %p732_p11 }
  0x22   :  { %742 = shalt.err (!%p739_p1)
}
  0x23   :  { %29 = dma.hbm_to_vmem [thread:$0]  %s1062_s0, 128, %s27_s30, [#allocation4]  }
  0x24   :  { %s843_s28 = smov [#allocation8]   ;;  %s743_s11 = scalar_lea.hbm %s1064_s2, 512 }
  0x25   :  { %s45_s29 = sshll.u32 %s843_s28, 4  ;;  %p744_p2 = scmp.ne.s32.totalorder %s1064_s2, %s743_s11  ;;  %s46_s29 = int_to_ptr.vmem [resolvable:$true] %s45_s29 }
  0x26   :  { %p747_p3 = scmp.lt.u32.totalorder %s743_s11, %s1064_s2 }
  0x28   :  { %p749_p4 = pnand %p747_p3, %p744_p2 }
  0x2a   :  { %752 = shalt.err (!%p749_p4)
}
  0x2b   :  { %s753_s16 = scalar_lea.vmem %s46_s29, 512  ;;  %p758_p6 = scmp.lt.s32.totalorder %s46_s29, %s46_s29 }
  0x2c   :  { %p754_p5 = scmp.ne.s32.totalorder %s46_s29, %s753_s16  ;;  %p759_p7 = scmp.lt.s32.totalorder %s753_s16, %s753_s16 }
  0x2e   :  { %p760_p8 = por %p759_p7, %p758_p6 }
  0x30   :  { %p761_p9 = pnand %p760_p8, %p754_p5 }
  0x32   :  { %764 = shalt.err (!%p761_p9)
}
  0x33   :  { %s844_s0 = smov 128   ;;  %s845_s30 = smov 8  }
  0x34   :  { %51 = dma.hbm_to_vmem [thread:$0]  %s1064_s2, 512, %s46_s29, [#allocation7], %s844_s0, %s844_s0, %s845_s30  }
  0x35   :  { %s846_s19 = smov [#allocation9]   ;;  %s765_s23 = scalar_lea.hbm %s1065_s3, 1024 }
  0x36   :  { %s57_s20 = sshll.u32 %s846_s19, 4  ;;  %p766_p10 = scmp.ne.s32.totalorder %s1065_s3, %s765_s23  ;;  %s58_s20 = int_to_ptr.vmem [resolvable:$true] %s57_s20 }
  0x37   :  { %p769_p11 = scmp.lt.u32.totalorder %s765_s23, %s1065_s3 }
  0x39   :  { %p771_p12 = pnand %p769_p11, %p766_p10 }
  0x3b   :  { %774 = shalt.err (!%p771_p12)
}
  0x3c   :  { %s775_s27 = scalar_lea.vmem %s58_s20, 1024  ;;  %p780_p0 = scmp.lt.s32.totalorder %s58_s20, %s58_s20 }
  0x3d   :  { %p776_p13 = scmp.ne.s32.totalorder %s58_s20, %s775_s27  ;;  %p781_p1 = scmp.lt.s32.totalorder %s775_s27, %s775_s27 }
  0x3f   :  { %p782_p2 = por %p781_p1, %p780_p0 }
  0x41   :  { %p783_p3 = pnand %p782_p2, %p776_p13 }
  0x43   :  { %786 = shalt.err (!%p783_p3)
}
  0x44   :  { %63 = dma.hbm_to_vmem [thread:$0]  %s1065_s3, 1024, %s58_s20, [#allocation10], %s844_s0, %s844_s0, %s845_s30  }
  0x45   :  { %831 = dma.done.wait [#allocation4], 128  }
  0x46   :  { %832 = vsyncadd [#allocation4], 4294967168 }
  0x47   :  { %833 = dma.done.wait [#allocation7], 640  }
  0x48   :  { %834 = vsyncadd [#allocation7], 4294966656 }
  0x49   :  { %835 = dma.done.wait [#allocation10], 1024  }
  0x4a   :  { %836 = vsyncadd [#allocation10], 4294966272  ;;  %v847_v0 = vmov 0.0|0.0   ;;  %vm848_vm0 = vmmov 0   ;;  %v849_v1 = vmov 0.0   ;;  %v88_v2 = vld [vmem:[#allocation9] sm:$0xff] }
  0x4b   :  { %646 = vmatprep.subr.bf16.mxu0 %v847_v0  ;;  %658 = vmatprep.subr.bf16.mxu1 %v847_v0  ;;  %v89_v3 = vld [vmem:[#allocation9 + $0x8] sm:$0xff]  ;;  %v90_v4 = vld [vmem:[#allocation9 + $0x10] sm:$0xff]  ;;  %v91_v6 = vld [vmem:[#allocation9 + $0x18] sm:$0xff]  ;;  %vm170_vm1 = vcmask 261120   ;;  %vm96_vm2 = vcmask 523264   ;;  %s856_s10 = smov [#allocation12]  }
  0x4c   :  { %638 = vmatprep.mubr.msk.f32.mxu1 %vm848_vm0, %v849_v1  ;;  %627 = vmatprep.mubr.msk.f32.mxu0 %vm848_vm0, %v849_v1  ;;  %v647_v5 = vpack.c.bf16 %v89_v3, %v88_v2  ;;  %v84_v7 = vld [vmem:[#allocation8] sm:$0xff]  ;;  %v85_v8 = vld [vmem:[#allocation8 + $0x8] sm:$0xff]  ;;  %v86_v10 = vld [vmem:[#allocation8 + $0x10] sm:$0xff]  ;;  %v650_v11 = vpack.c.bf16 %v91_v6, %v90_v4  ;;  %v850_v51 = vmov 683565275   ;;  %s567_s11 = sshll.u32 %s856_s10, 4  ;;  %s568_s11 = int_to_ptr.vmem [resolvable:$true] %s567_s11 }
  0x4d   :  { %v659_v9 = vpack.c.bf16 %v85_v8, %v84_v7  ;;  %v87_v12 = vld [vmem:[#allocation8 + $0x18] sm:$0xff]  ;;  %v92_v13 = vld [vmem:[#allocation9 + $0x20] sm:$0xff]  ;;  %v93_v14 = vld [vmem:[#allocation9 + $0x28] sm:$0xff]  ;;  %v851_v55 = vmov 2475754826   ;;  %s787_s12 = scalar_lea.vmem %s568_s11, 128  ;;  %p792_p5 = scmp.lt.s32.totalorder %s568_s11, %s568_s11 }
  0x4e   :  { %648 = vmatpush3.bf16.msra.mxu0 %v647_v5  ;;  %v662_v15 = vpack.c.bf16 %v87_v12, %v86_v10  ;;  %v653_v16 = vpack.c.bf16 %v93_v14, %v92_v13  ;;  %v94_v17 = vld [vmem:[#allocation9 + $0x30] sm:$0xff]  ;;  %v95_v18 = vld [vmem:[#allocation9 + $0x38] sm:$0xff]  ;;  %v852_v57 = vmov 2131351028   ;;  %v853_v59 = vmov 2102212464   ;;  %p788_p4 = scmp.ne.s32.totalorder %s568_s11, %s787_s12  ;;  %p793_p6 = scmp.lt.s32.totalorder %s787_s12, %s787_s12 }
  0x4f   :  { %649 = vmatprep.subr.bf16.mxu0 %v847_v0  ;;  %660 = vmatpush3.bf16.msra.mxu1 %v659_v9  ;;  %v82_v19 = vld [vmem:[#allocation3] sm:$0xff]  ;;  %v656_v20 = vpack.c.bf16 %v95_v18, %v94_v17  ;;  %v954_v21 = vld [vmem:[#allocation6] sm:$0xff]  ;;  %v854_v61 = vmov 920167782   ;;  %v855_v4 = vmov 1326507024  }
  0x50   :  { %661 = vmatprep.subr.bf16.mxu1 %v847_v0  ;;  %v584_v25 = vld [vmem:[%s1066_s4] ss:$0 sm:$0xff]  ;;  %p794_p7 = por %p793_p6, %p792_p5 }
  0x52   :  { %651 = vmatpush3.bf16.msra.mxu0 %v650_v11  ;;  %p795_p8 = pnand %p794_p7, %p788_p4 }
  0x53   :  { %652 = vmatprep.subr.bf16.mxu0 %v847_v0  ;;  %663 = vmatpush3.bf16.msra.mxu1 %v662_v15 }
  0x54   :  { %641 = vmatprep.subr.mxu1 %v849_v1 }
  0x56   :  { %654 = vmatpush3.bf16.msra.mxu0 %v653_v16  ;;  %639 = vmatmul.mubr.msk.f32.vlgmr.msra.gmra.mrb[0].mxu1 %vm170_vm1, %v82_v19 }
  0x57   :  { %655 = vmatprep.subr.bf16.mxu0 %v847_v0  ;;  %643 = vmatprep.mubr.msk.f32.mxu1 %vm848_vm0, %v849_v1 }
  0x5a   :  { %657 = vmatpush3.bf16.msra.mxu0 %v656_v20 }
  0x5d   :  { %628 = vmatmul.mubr.msk.f32.vlgmr.msra.gmra.mrb[0].mxu0 %vm96_vm2, %v954_v21 }
 0x129   :  { %v240_v22 = vpop.f32.mrb[0].mxu1 }
 0x12a   :  { %v640_v23 = vpop.f32.mrb[1].mxu1 }
 0x130   :  { %v166_v24 = vpop.f32.mrb[0].mxu0 }
 0x131   :  { %v241_v26 = vadd.f32 %v240_v22, %v166_v24  ;;  %v629_v27 = vpop.f32.mrb[1].mxu0 }
 0x133   :  { %v961_v28 = vadd.f32 %v584_v25, %v241_v26 }
 0x135   :  { %v964_v29 = vmul.f32 0.8, %v961_v28  ;;  %v967_v30 = vmul.f32 0.2, %v961_v28 }
 0x137   :  { %v254_v31 = vand.u32 2147483647, %v964_v29  ;;  %v257_v32 = vand.u32 2139095040, %v964_v29  ;;  %v362_v33 = vand.u32 2139095040, %v967_v30  ;;  %v359_v36 = vand.u32 2147483647, %v967_v30 }
 0x138   :  { %vm256_vm1 = vcmp.lt.s32.totalorder %v964_v29, 0 }
 0x139   :  { %v258_v34 = vshrl.u32 %v257_v32, 23  ;;  %v261_v35 = vand.u32 8388607, %v254_v31  ;;  %v363_v37 = vshrl.u32 %v362_v33, 23  ;;  %v977_v42 = vand.u32 8388607, %v359_v36 }
 0x13b   :  { %v585_v38 = vadd.s32 4294967169, %v258_v34  ;;  %v589_v39 = vadd.s32 4294967169, %v363_v37  ;;  %v262_v41 = vor.u32 8388608, %v261_v35  ;;  %v367_v49 = vor.u32 8388608, %v977_v42 }
 0x13d   :  { %v264_v40 = vadd.s32 1, %v585_v38  ;;  %v369_v43 = vadd.s32 1, %v589_v39  ;;  %v979_v48 = vshll.u32 %v262_v41, 8 }
 0x13f   :  { %vm265_vm3 = vcmp.gt.s32.totalorder %v264_v40, 0  ;;  %vm370_vm4 = vcmp.gt.s32.totalorder %v369_v43, 0 }
 0x140   :  { %v266_v44 = vsel %vm265_vm3, %v264_v40, 0  ;;  %v371_v47 = vsel %vm370_vm4, %v369_v43, 0  ;;  %vm255_vm3 = vcmp.le.f32.partialorder %v254_v31, 0.7853982  ;;  %vm361_vm4 = vcmp.lt.s32.totalorder %v967_v30, 0 }
 0x141   :  { %v267_v45 = vshrl.u32 %v266_v44, 5  ;;  %v268_v46 = vand.u32 31, %v266_v44  ;;  %v982_v53 = vshrl.u32 %v371_v47, 5  ;;  %v373_v54 = vand.u32 31, %v371_v47 }
 0x143   :  { %v269_v50 = vsub.s32 32, %v268_v46  ;;  %v271_v52 = vshll.u32 %v850_v51, %v268_v46  ;;  %v274_v56 = vshll.u32 %v851_v55, %v268_v46  ;;  %v277_v58 = vshll.u32 %v852_v57, %v268_v46 }
 0x144   :  { %v280_v60 = vshll.u32 %v853_v59, %v268_v46  ;;  %v283_v62 = vshll.u32 %v854_v61, %v268_v46  ;;  %vm286_vm5 = vcmp.lt.s32.totalorder %v267_v45, 1  ;;  %vm287_vm6 = vcmp.lt.s32.totalorder %v267_v45, 2 }
 0x145   :  { %v272_v63 = vshrl.u32 %v851_v55, %v269_v50  ;;  %v275_v0 = vshrl.u32 %v852_v57, %v269_v50  ;;  %v278_v1 = vshrl.u32 %v853_v59, %v269_v50  ;;  %v270_v2 = vshrl.u32 %v850_v51, %v269_v50 }
 0x146   :  { %v281_v3 = vshrl.u32 %v854_v61, %v269_v50  ;;  %v284_v5 = vshrl.u32 %v855_v4, %v269_v50  ;;  %v374_v9 = vsub.s32 32, %v373_v54  ;;  %vm288_vm7 = vcmp.lt.s32.totalorder %v267_v45, 3 }
 0x147   :  { %v273_v6 = vor.u32 %v272_v63, %v271_v52  ;;  %v276_v7 = vor.u32 %v275_v0, %v274_v56  ;;  %v279_v8 = vor.u32 %v278_v1, %v277_v58  ;;  %vm289_vm8 = vcmp.lt.s32.totalorder %v267_v45, 4 }
 0x148   :  { %v282_v10 = vor.u32 %v281_v3, %v280_v60  ;;  %v285_v11 = vor.u32 %v284_v5, %v283_v62  ;;  %v376_v19 = vshll.u32 %v850_v51, %v373_v54  ;;  %v377_v23 = vshrl.u32 %v851_v55, %v374_v9 }
 0x149   :  { %v290_v12 = vsel %vm286_vm5, %v270_v2, %v273_v6  ;;  %v291_v13 = vsel %vm289_vm8, %v279_v8, 2102212464  ;;  %v294_v14 = vsel %vm286_vm5, %v273_v6, %v276_v7  ;;  %v298_v15 = vsel %vm286_vm5, %v276_v7, %v279_v8 }
 0x14a   :  { %v292_v16 = vsel %vm288_vm7, %v276_v7, %v291_v13  ;;  %v295_v17 = vsel %vm289_vm8, %v282_v10, 920167782  ;;  %v299_v18 = vsel %vm289_vm8, %v285_v11, 1326507024  ;;  %v379_v24 = vshll.u32 %v851_v55, %v373_v54 }
 0x14b   :  { %v296_v20 = vsel %vm288_vm7, %v279_v8, %v295_v17  ;;  %v300_v22 = vsel %vm288_vm7, %v282_v10, %v299_v18  ;;  %v293_v25 = vsel %vm287_vm6, %v290_v12, %v292_v16  ;;  %v380_v32 = vshrl.u32 %v852_v57, %v374_v9 }
 0x14c   :  { %v297_v26 = vsel %vm287_vm6, %v294_v14, %v296_v20  ;;  %v301_v27 = vsel %vm287_vm6, %v298_v15, %v300_v22  ;;  %v378_v38 = vor.u32 %v377_v23, %v376_v19  ;;  %v382_v40 = vshll.u32 %v852_v57, %v373_v54 }
 0x14d   :  { %v991_v33 = vmul.u32.u64.low %v979_v48, %v301_v27  ;;  %v992_v34 = vmul.u32.u64.high %v979_v48, %v301_v27, %v991_v33  ;;  %v995_v35 = vmul.u32.u64.low %v979_v48, %v297_v26  ;;  %v996_v37 = vmul.u32.u64.high %v979_v48, %v297_v26, %v995_v35 }
 0x14e   :  { %v381_v39 = vor.u32 %v380_v32, %v379_v24  ;;  %v383_v41 = vshrl.u32 %v853_v59, %v374_v9  ;;  %v385_v42 = vshll.u32 %v853_v59, %v373_v54  ;;  %v386_v43 = vshrl.u32 %v854_v61, %v374_v9 }
 0x14f   :  { %v389_v44 = vshrl.u32 %v855_v4, %v374_v9  ;;  %v407_v46 = vshll.u32 %v367_v49, 8  ;;  %v309_v45 = vmul.u32 %v979_v48, %v293_v25  ;;  %v375_v47 = vshrl.u32 %v850_v51, %v374_v9 }
 0x150   :  { %v384_v50 = vor.u32 %v383_v41, %v382_v40  ;;  %v388_v52 = vshll.u32 %v854_v61, %v373_v54  ;;  %vm311_vm9 = vc.u32 %v992_v34, %v995_v35  ;;  %v312_v55 = vadd.s32 1, %v996_v37 }
 0x151   :  { %v387_v56 = vor.u32 %v386_v43, %v385_v42  ;;  %vm391_vm10 = vcmp.lt.s32.totalorder %v982_v53, 1  ;;  %vm393_vm11 = vcmp.lt.s32.totalorder %v982_v53, 3  ;;  %vm394_vm12 = vcmp.lt.s32.totalorder %v982_v53, 4 }
 0x152   :  { %v390_v58 = vor.u32 %v389_v44, %v388_v52  ;;  %v399_v57 = vsel %vm391_vm10, %v378_v38, %v381_v39  ;;  %v313_v49 = vsel %vm311_vm9, %v312_v55, %v996_v37  ;;  %v396_v59 = vsel %vm394_vm12, %v384_v50, 2102212464 }
 0x153   :  { %v400_v48 = vsel %vm394_vm12, %v387_v56, 920167782  ;;  %v403_v51 = vsel %vm391_vm10, %v381_v39, %v384_v50  ;;  %v314_v60 = vadd.s32 %v313_v49, %v309_v45  ;;  %vm392_vm13 = vcmp.lt.s32.totalorder %v982_v53, 2 }
 0x154   :  { %v401_v54 = vsel %vm393_vm11, %v384_v50, %v400_v48  ;;  %v404_v61 = vsel %vm394_vm12, %v390_v58, 1326507024  ;;  %v395_v62 = vsel %vm391_vm10, %v375_v47, %v378_v38  ;;  %v397_v63 = vsel %vm393_vm11, %v381_v39, %v396_v59 }
 0x155   :  { %v402_v0 = vsel %vm392_vm13, %v399_v57, %v401_v54  ;;  %v405_v1 = vsel %vm393_vm11, %v387_v56, %v404_v61  ;;  %v315_v2 = vadd.s32 536870912, %v314_v60  ;;  %v398_v9 = vsel %vm392_vm13, %v395_v62, %v397_v63 }
 0x156   :  { %v406_v3 = vsel %vm392_vm13, %v403_v51, %v405_v1  ;;  %v1006_v4 = vmul.u32.u64.low %v407_v46, %v402_v0  ;;  %v1007_v5 = vmul.u32.u64.high %v407_v46, %v402_v0, %v1006_v4  ;;  %v414_v53 = vmul.u32 %v407_v46, %v398_v9 }
 0x157   :  { %v1009_v6 = vmul.u32.u64.low %v407_v46, %v406_v3  ;;  %v1010_v7 = vmul.u32.u64.high %v407_v46, %v406_v3, %v1009_v6  ;;  %v316_v8 = vshrl.u32 %v315_v2, 30  ;;  %v310_v26 = vadd.s32 %v995_v35, %v992_v34 }
 0x158   :  { %v417_v11 = vadd.s32 1, %v1007_v5  ;;  %vm360_vm5 = vcmp.le.f32.partialorder %v359_v36, 0.7853982  ;;  %vm346_vm9 = vweird.f32 %v964_v29  ;;  %vm451_vm13 = vweird.f32 %v967_v30 }
 0x159   :  { %v317_v10 = vshll.u32 %v316_v8, 30  ;;  %vm416_vm14 = vc.u32 %v1010_v7, %v1006_v4  ;;  %v415_v50 = vadd.s32 %v1006_v4, %v1010_v7  ;;  %v340_v35 = vsub.s32 4, %v316_v8 }
 0x15a   :  { %v418_v13 = vsel %vm416_vm14, %v417_v11, %v1007_v5 }
 0x15b   :  { %v318_v12 = vsub.s32 %v314_v60, %v317_v10  ;;  %v419_v14 = vadd.s32 %v418_v13, %v414_v53  ;;  %v341_v60 = vsel %vm256_vm1, %v340_v35, %v316_v8 }
 0x15c   :  { %v343_v62 = vsel %vm255_vm3, 0, %v341_v60 }
 0x15d   :  { %v320_v15 = vsub.s32 0, %v318_v12  ;;  %v420_v16 = vadd.s32 536870912, %v419_v14  ;;  %v347_v3 = vadd.s32 3, %v343_v62 }
 0x15f   :  { %v586_v17 = vmin.u32 %v320_v15, %v318_v12  ;;  %v421_v18 = vshrl.u32 %v420_v16, 30  ;;  %v348_v7 = vand.u32 3, %v347_v3 }
 0x161   :  { %v322_v19 = vclz %v586_v17  ;;  %v422_v20 = vshll.u32 %v421_v18, 30  ;;  %v445_v2 = vsub.s32 4, %v421_v18  ;;  %vm353_vm6 = vcmp.eq.s32.totalorder %v348_v7, 2 }
 0x162   :  { %vm350_vm7 = vcmp.eq.s32.totalorder %v348_v7, 0  ;;  %vm349_vm8 = vcmp.lt.s32.totalorder %v348_v7, 2 }
 0x163   :  { %v587_v22 = vadd.s32 4294967294, %v322_v19  ;;  %v423_v23 = vsub.s32 %v419_v14, %v422_v20  ;;  %v446_v5 = vsel %vm361_vm4, %v445_v2, %v421_v18 }
 0x164   :  { %v448_v9 = vsel %vm360_vm5, 0, %v446_v5 }
 0x165   :  { %vm588_vm15 = vcmp.lt.s32.totalorder %v587_v22, 0  ;;  %v425_v25 = vsub.s32 0, %v423_v23 }
 0x166   :  { %v325_v24 = vsel %vm588_vm15, 0, %v587_v22 }
 0x167   :  { %v326_v27 = vsub.s32 32, %v325_v24  ;;  %v330_v32 = vsub.s32 4294967266, %v325_v24  ;;  %v590_v33 = vmin.u32 %v425_v25, %v423_v23  ;;  %v327_v37 = vshll.u32 %v318_v12, %v325_v24 }
 0x168   :  { %v452_v12 = vadd.s32 3, %v448_v9 }
 0x169   :  { %v328_v38 = vshrl.u32 %v310_v26, %v326_v27  ;;  %v331_v39 = vadd.s32 127, %v330_v32  ;;  %v427_v40 = vclz %v590_v33  ;;  %v466_v32 = vmul.f32 0.9, %v954_v21 }
 0x16a   :  { %v453_v16 = vand.u32 3, %v452_v12 }
 0x16b   :  { %v329_v41 = vor.u32 %v328_v38, %v327_v37  ;;  %v332_v42 = vshll.u32 %v331_v39, 23  ;;  %v591_v43 = vadd.s32 4294967294, %v427_v40 }
 0x16c   :  { %vm458_vm10 = vcmp.eq.s32.totalorder %v453_v16, 2  ;;  %vm455_vm11 = vcmp.eq.s32.totalorder %v453_v16, 0  ;;  %vm454_vm12 = vcmp.lt.s32.totalorder %v453_v16, 2 }
 0x16d   :  { %v333_v44 = vor.u32 4788187, %v332_v42  ;;  %vm592_vm0 = vcmp.lt.s32.totalorder %v591_v43, 0  ;;  %v336_v45 = vcvt.s32.f32 %v329_v41 }
 0x16e   :  { %v430_v47 = vsel %vm592_vm0, 0, %v591_v43 }
 0x16f   :  { %v334_v46 = vand.u32 2147483647, %v333_v44  ;;  %v431_v52 = vsub.s32 32, %v430_v47  ;;  %v435_v55 = vsub.s32 4294967266, %v430_v47  ;;  %v432_v56 = vshll.u32 %v423_v23, %v430_v47 }
 0x171   :  { %v337_v34 = vmul.f32 %v336_v45, %v334_v46  ;;  %v433_v58 = vshrl.u32 %v415_v50, %v431_v52  ;;  %v436_v57 = vadd.s32 127, %v435_v55 }
 0x173   :  { %v338_v49 = vxor.u32 2147483648, %v337_v34  ;;  %v434_v59 = vor.u32 %v433_v58, %v432_v56  ;;  %v437_v48 = vshll.u32 %v436_v57, 23 }
 0x175   :  { %v339_v51 = vsel %vm256_vm1, %v338_v49, %v337_v34  ;;  %v438_v61 = vor.u32 4788187, %v437_v48  ;;  %v441_v0 = vcvt.s32.f32 %v434_v59 }
 0x176   :  { %v342_v54 = vsel %vm255_vm3, %v964_v29, %v339_v51 }
 0x177   :  { %689 = vcosq.f32 %v342_v54  ;;  %v439_v63 = vand.u32 2147483647, %v438_v61 }
 0x178   :  { %691 = vsinq.f32 %v342_v54 }
 0x179   :  { %v442_v1 = vmul.f32 %v441_v0, %v439_v63 }
 0x17b   :  { %v443_v4 = vxor.u32 2147483648, %v442_v1 }
 0x17d   :  { %v444_v31 = vsel %vm361_vm4, %v443_v4, %v442_v1 }
 0x17e   :  { %v447_v6 = vsel %vm360_vm5, %v967_v30, %v444_v31 }
 0x17f   :  { %693 = vcosq.f32 %v447_v6 }
 0x180   :  { %695 = vsinq.f32 %v447_v6 }
 0x181   :  { %v690_v8 = vpop.eup %689  ;;  %697 = vtanh.f32 %v961_v28  ;;  %v470_v28 = vld [vmem:[%s1067_s5] sm:$0x1] }
 0x182   :  { %v692_v10 = vpop.eup %691  ;;  %v354_v11 = vxor.u32 2147483648, %v690_v8 }
 0x183   :  { %v351_v53 = vxor.u32 2147483648, %v692_v10 }
 0x184   :  { %v355_v13 = vsel %vm353_vm6, %v354_v11, %v692_v10 }
 0x185   :  { %v352_v14 = vsel %vm350_vm7, %v690_v8, %v351_v53 }
 0x186   :  { %v356_v36 = vsel %vm349_vm8, %v352_v14, %v355_v13 }
 0x187   :  { %v357_v15 = vsel %vm346_vm9, nan, %v356_v36 }
 0x189   :  { %v694_v17 = vpop.eup %693 }
 0x18a   :  { %v696_v18 = vpop.eup %695  ;;  %v459_v19 = vxor.u32 2147483648, %v694_v17 }
 0x18b   :  { %v456_v20 = vxor.u32 2147483648, %v696_v18  ;;  %v698_v27 = vpop.eup %697 }
 0x18c   :  { %v460_v22 = vsel %vm458_vm10, %v459_v19, %v696_v18 }
 0x18d   :  { %v457_v23 = vsel %vm455_vm11, %v694_v17, %v456_v20 }
 0x18e   :  { %v461_v24 = vsel %vm454_vm12, %v457_v23, %v460_v22 }
 0x18f   :  { %v462_v25 = vsel %vm451_vm13, nan, %v461_v24 }
 0x190   :  { %v463_v26 = vadd.f32 %v462_v25, %v357_v15 }
 0x192   :  { %v464_v29 = vmul.f32 0.05, %v463_v26 }
 0x194   :  { %v465_v33 = vadd.f32 %v698_v27, %v464_v29 }
 0x196   :  { %642 = vmatpush3.xpose.msk.msra.mxu1 %vm96_vm2, %v465_v33  ;;  %v467_v37 = vmul.f32 0.1, %v465_v33 }
 0x198   :  { %v468_v38 = vadd.f32 %v467_v37, %v466_v32 }
 0x199   :  { %644 = vmatmul.mubr.msk.f32.vlgmr.msra.gmra.mrb[2].mxu1 %vm96_vm2, %v470_v28 }
 0x19a   :  { %469 = vst.msk [vmem:[#allocation12] sm:$0xff] %vm96_vm2, %v468_v38 }
 0x19b   :  { %798 = shalt.err (!%p795_p8)
}
 0x19c   :  { %s799_s5 = scalar_lea.hbm %s1070_s8, 128 }
 0x19d   :  { %p800_p9 = scmp.ne.s32.totalorder %s1070_s8, %s799_s5  ;;  %p803_p10 = scmp.lt.u32.totalorder %s799_s5, %s1070_s8 }
 0x19f   :  { %p805_p11 = pnand %p803_p10, %p800_p9 }
 0x1a1   :  { %808 = shalt.err (!%p805_p11)
}
 0x1a2   :  { %570 = dma.vmem_to_hbm [thread:$0]  %s568_s11, 128, %s1070_s8, [#allocation13]   ;;  %v472_v21 = vstv %s1068_s6  ;;  %vm549_vm2 = vcmask 57344  }
 0x1a3   :  { %s857_s21 = smov [#allocation11]  }
 0x1a4   :  { %s557_s22 = sshll.u32 %s857_s21, 4  ;;  %s558_s22 = int_to_ptr.vmem [resolvable:$true] %s557_s22 }
 0x1a5   :  { %s809_s23 = scalar_lea.vmem %s558_s22, 16  ;;  %s813_s24 = scalar_lea.vmem %s558_s22, 32 }
 0x1a6   :  { %p810_p12 = scmp.ne.s32.totalorder %s558_s22, %s809_s23  ;;  %p814_p13 = scmp.lt.s32.totalorder %s558_s22, %s558_s22 }
 0x1a7   :  { %p815_p0 = scmp.lt.s32.totalorder %s813_s24, %s809_s23 }
 0x1a9   :  { %p816_p1 = por %p815_p0, %p814_p13 }
 0x1ab   :  { %p817_p2 = pnand %p816_p1, %p810_p12 }
 0x26c   :  { %v545_v30 = vpop.f32.mrb[2].mxu1 }
 0x26d   :  { %v546_v39 = vadd.f32 %v545_v30, %v472_v21  ;;  %v645_v40 = vpop.f32.mrb[3].mxu1 }
 0x26f   :  { %550 = vst.msk [vmem:[#allocation11] sm:$0x1] %vm549_vm2, %v546_v39 }
 0x270   :  { %820 = shalt.err (!%p817_p2)
}
 0x271   :  { %s821_s6 = scalar_lea.hbm %s1069_s7, 16 }
 0x272   :  { %p822_p3 = scmp.ne.s32.totalorder %s1069_s7, %s821_s6  ;;  %p825_p4 = scmp.lt.u32.totalorder %s821_s6, %s1069_s7 }
 0x274   :  { %p827_p5 = pnand %p825_p4, %p822_p3 }
 0x276   :  { %830 = shalt.err (!%p827_p5)
}
 0x277   :  { %560 = dma.vmem_to_hbm [thread:$0]  %s558_s22, 16, %s1069_s7, [#allocation5]  }
 0x278   :  { %837 = dma.done.wait [#allocation5], 16  }
 0x279   :  { %838 = vsyncadd [#allocation5], 4294967280 }
 0x27a   :  { %839 = dma.done.wait [#allocation13], 128  }
 0x27b   :  { %840 = vsyncadd [#allocation13], 4294967168 }
 0x27c   :  { %577 = vsyncpa [#allocation4], 1 }
 0x27d   :  { %578 = vsyncpa [#allocation7], 1 }
 0x27e   :  { %579 = vsyncpa [#allocation10], 1 }
 0x27f   :  { %580 = vsyncpa [#allocation5], 1 }
 0x280   :  { %581 = vsyncpa [#allocation13], 1 }

</bundles_post_ra>
